<compile_context>
chip_gen: v7x
topology: tpu7x:2x2x1
jax: 0.10.0
libtpu: 0.0.40
codegen_flags: <defaults>
</compile_context>

<pallas_src>
import functools

import jax
import jax.numpy as jnp
from jax.experimental import pallas as pl
from jax.experimental.pallas import tpu as pltpu


def _round_up(a: int, b: int) -> int:
    return pl.cdiv(a, b) * b


def _vmem_capacity_bytes() -> int:
    """Per-TensorCore VMEM capacity; conservative fallback if the query fails."""
    try:
        info = pltpu.get_tpu_info()
        for attr in ("vmem_capacity_bytes", "vmem_bytes", "vmem_size_bytes"):
            v = getattr(info, attr, None)
            if v:
                return int(v)
    except Exception:
        pass
    return 64 * 1024 * 1024  # v7x per-TC capacity (smallest across generations)


def _patch_embed_kernel(x_ref, w_ref, prm_ref, o_ref, *, e_true, eps):
    # x_ref:   (tm, K_pad)    streamed patch-matrix tile (input dtype)
    # w_ref:   (K_pad, E_pad) resident projection weight (input dtype, zero-padded)
    # prm_ref: (3, E_pad)     resident f32 rows = [bias; gamma; beta], zero-padded lanes
    # o_ref:   (tm, E_pad)    output tile (input dtype)
    y = jnp.dot(x_ref[...], w_ref[...], preferred_element_type=jnp.float32)
    y = y + prm_ref[0:1, :]                       # Conv2d bias (f32)

    # LayerNorm over the true E columns. Padded weight columns and bias lanes are zero,
    # so they contribute nothing to either reduction; padded gamma/beta lanes are zero,
    # so padded output columns are exactly 0 and get sliced off by the wrapper.
    inv_e = 1.0 / e_true
    mean = jnp.sum(y, axis=-1, keepdims=True) * inv_e
    mean_sq = jnp.sum(y * y, axis=-1, keepdims=True) * inv_e
    var = mean_sq - mean * mean                   # E[y^2] - E[y]^2, all f32
    inv = jax.lax.rsqrt(var + eps)
    o_ref[...] = ((y - mean) * inv * prm_ref[1:2, :] + prm_ref[2:3, :]).astype(o_ref.dtype)


def patch_embed(x_nchw, weight, bias, gamma, beta, patch_size, *, eps=1e-5, block_m=1024):
    """PatchEmbed forward (stride == patch_size, single Conv2d + LayerNorm).

    x_nchw: (B, C, H, W); weight: (E, C, p, p); bias/gamma/beta: (E,).
    Returns (B, N, E) with N = (H // p) * (W // p).
    """
    # TODO(synk): the multi_conv=True branch and stride != patch_size (overlapping
    # patches) of the PyTorch module are not implemented here.
    B, C, H, W = x_nchw.shape
    E = weight.shape[0]
    p = patch_size
    Gh, Gw = H // p, W // p
    N = Gh * Gw
    K = C * p * p
    M = B * N

    in_dtype = x_nchw.dtype
    in_bytes = jnp.dtype(in_dtype).itemsize

    # Lane-dense padding: E and K up to multiples of 128 (no-ops when already aligned).
    E_pad = _round_up(E, 128)
    K_pad = _round_up(K, 128)

    # ---- Tile size from the per-generation VMEM capacity --------------------------------
    cap = _vmem_capacity_bytes()
    budget = (cap * 78) // 100            # ~22% headroom for compiler-internal scratch
    resident = K_pad * E_pad * in_bytes + 3 * E_pad * 4
    per_row = (2 * K_pad * in_bytes       # double-buffered streamed x tile
               + 2 * E_pad * in_bytes     # double-buffered output tile
               + 2 * E_pad * 4)           # f32 intermediates (y, y*y) inside the kernel
    tm_vmem = max(8, (budget - resident) // per_row)

    tm = int(min(block_m, _round_up(M, 8), tm_vmem))
    if tm >= 256:
        tm = (tm // 256) * 256            # match the 256-wide/deep MXU on v6e/v7x
    else:
        tm = max(8, (tm // 8) * 8)
    # Guarantee >= 2 grid steps so the "parallel" M axis can shard across both
    # TensorCores on v7x and the input/output streams actually double-buffer.
    while pl.cdiv(M, tm) < 2 and tm > 8:
        tm = max(8, _round_up(tm // 2, 8))
    M_pad = _round_up(M, tm)

    # ---- Patchify + flatten weight (XLA side) --------------------------------------------
    # (B, C, Gh, p, Gw, p) -> (B, Gh, Gw, C, p, p) -> (M, K); K in (c, kh, kw) order,
    # matching the Conv2d weight layout. Row/col zero-padding folds into the same XLA
    # copy fusion. The patch-matrix operand is marked allow_input_fusion=True below so
    # XLA may fuse this producer into the kernel's input fetch instead of an HBM pass.
    xp = x_nchw.reshape(B, C, Gh, p, Gw, p)
    xp = jnp.transpose(xp, (0, 2, 4, 1, 3, 5)).reshape(M, K)
    if M_pad != M or K_pad != K:
        xp = jnp.pad(xp, ((0, M_pad - M), (0, K_pad - K)))

    # Conv2d weight (E, C, p, p) -> (K_pad, E_pad) in the input dtype (bf16 MXU operands
    # when the model runs bf16; f32 accumulation happens in the kernel). Zero padding
    # keeps padded rows/lanes contributing exactly 0.
    w2d = jnp.transpose(weight.reshape(E, K)).astype(in_dtype)
    if K_pad != K or E_pad != E:
        w2d = jnp.pad(w2d, ((0, K_pad - K), (0, E_pad - E)))

    # bias / gamma / beta packed into one resident (3, E_pad) f32 operand.
    prm = jnp.stack([bias, gamma, beta]).astype(jnp.float32)
    if E_pad != E:
        prm = jnp.pad(prm, ((0, 0), (0, E_pad - E)))

    vmem_needed = resident + tm * per_row
    vmem_limit = int(min(cap, max((vmem_needed * 5) // 4, 16 * 1024 * 1024)))

    kernel = functools.partial(_patch_embed_kernel, e_true=E, eps=eps)

    out = pl.pallas_call(
        kernel,
        out_shape=jax.ShapeDtypeStruct((M_pad, E_pad), in_dtype),
        grid_spec=pltpu.PrefetchScalarGridSpec(
            num_scalar_prefetch=0,
            grid=(M_pad // tm,),
            in_specs=[
                pl.BlockSpec((tm, K_pad), lambda i: (i, 0)),     # streamed patch rows
                pl.BlockSpec((K_pad, E_pad), lambda i: (0, 0)),  # resident weight
                pl.BlockSpec((3, E_pad), lambda i: (0, 0)),      # resident bias/gamma/beta
            ],
            out_specs=pl.BlockSpec((tm, E_pad), lambda i: (i, 0)),
        ),
        compiler_params=pltpu.CompilerParams(
            dimension_semantics=("parallel",),   # shard M across TCs on multi-core chips
            vmem_limit_bytes=vmem_limit,
            allow_input_fusion=[True, False, False],
        ),
        cost_estimate=pl.CostEstimate(
            flops=2 * M_pad * K_pad * E_pad,
            transcendentals=0,
            bytes_accessed=(M_pad * K_pad * in_bytes + K_pad * E_pad * in_bytes
                            + 3 * E_pad * 4 + M_pad * E_pad * in_bytes),
        ),
    )(xp, w2d, prm)

    # When no padding was needed the reshape is free metadata; otherwise the slice is one
    # extra output copy (a consumer could choose to accept the padded (M_pad, E_pad) slab).
    if M_pad == M and E_pad == E:
        return out.reshape(B, N, E)
    return out[:M, :E].reshape(B, N, E)


if __name__ == "__main__":
    # Small config consistent with the module: img_size=16, patch_size=4,
    # in_channels=4, embed_dim=32 -> grid_size=4, num_patches=16.
    B, C, img, p, E = 2, 4, 16, 4, 32

    key = jax.random.PRNGKey(0)
    kx, kw, kb, kg, kbt = jax.random.split(key, 5)

    x = jax.random.normal(kx, (B, C, img, img), dtype=jnp.float32)
    weight = jax.random.normal(kw, (E, C, p, p), dtype=jnp.float32) * 0.02
    bias = jax.random.normal(kb, (E,), dtype=jnp.float32) * 0.02
    gamma = jnp.ones((E,), dtype=jnp.float32) + 0.1 * jax.random.normal(kg, (E,))
    beta = 0.1 * jax.random.normal(kbt, (E,), dtype=jnp.float32)

    out = patch_embed(x, weight, bias, gamma, beta, patch_size=p)
    jax.block_until_ready(out)

    # Reference in plain JAX (conv as patchify-matmul + LayerNorm).
    Gh = img // p
    N = Gh * Gh
    xp = jnp.transpose(x.reshape(B, C, Gh, p, Gh, p), (0, 2, 4, 1, 3, 5)).reshape(B * N, -1)
    y = xp @ weight.reshape(E, -1).T + bias
    mean = y.mean(-1, keepdims=True)
    var = ((y - mean) ** 2).mean(-1, keepdims=True)
    ref = ((y - mean) / jnp.sqrt(var + 1e-5) * gamma + beta).reshape(B, N, E)

    assert out.shape == (B, N, E), out.shape
    assert jnp.allclose(out, ref, atol=1e-4, rtol=1e-4), "mismatch vs reference"
    print("KERNEL_OK")
</pallas_src>

<mosaic_0001>
module attributes {stable_mosaic.version = 11 : i64} {
  func.func @_patch_embed_kernel(%arg0: i32, %arg1: memref<16x128xf32, #tpu.memory_space<vmem>>, %arg2: memref<128x128xf32, #tpu.memory_space<vmem>>, %arg3: memref<3x128xf32, #tpu.memory_space<vmem>>, %arg4: memref<16x128xf32, #tpu.memory_space<vmem>>) attributes {dimension_semantics = [#tpu.dimension_semantics<parallel>], iteration_bounds = array<i64: 2>, scalar_prefetch = 0 : i64, scratch_operands = 0 : i64, tpu.core_type = #tpu.core_type<tc>, window_params = [{transform_indices = @transform_0, window_bounds = array<i64: 16, 128>}, {pipeline_mode = #tpu.pipeline_mode<synchronous>, transform_indices = @transform_1, window_bounds = array<i64: 128, 128>}, {pipeline_mode = #tpu.pipeline_mode<synchronous>, transform_indices = @transform_2, window_bounds = array<i64: 3, 128>}, {transform_indices = @transform_3, window_bounds = array<i64: 16, 128>}]} {
    %c0 = arith.constant 0 : index
    %c0_0 = arith.constant 0 : index
    %0 = vector.load %arg1[%c0, %c0_0] : memref<16x128xf32, #tpu.memory_space<vmem>>, vector<16x128xf32>
    %c0_1 = arith.constant 0 : index
    %c0_2 = arith.constant 0 : index
    %1 = vector.load %arg2[%c0_1, %c0_2] : memref<128x128xf32, #tpu.memory_space<vmem>>, vector<128x128xf32>
    %cst = arith.constant dense<0.000000e+00> : vector<16x128xf32>
    %2 = tpu.matmul %0, %1, %cst {dimension_numbers = #tpu.dot_dimension_numbers<[1], [0], [0], [1], [0, 0, 1, 1], [], []>} : vector<16x128xf32>, vector<128x128xf32>, vector<16x128xf32> -> vector<16x128xf32>
    %c0_3 = arith.constant 0 : index
    %c0_4 = arith.constant 0 : index
    %3 = vector.load %arg3[%c0_3, %c0_4] : memref<3x128xf32, #tpu.memory_space<vmem>>, vector<1x128xf32>
    %4 = vector.broadcast %3 : vector<1x128xf32> to vector<16x128xf32>
    %5 = arith.addf %2, %4 : vector<16x128xf32>
    %cst_5 = arith.constant dense<0.000000e+00> : vector<16xf32>
    %6 = vector.multi_reduction <add>, %5, %cst_5 [1] : vector<16x128xf32> to vector<16xf32>
    %7 = vector.shape_cast %6 : vector<16xf32> to vector<16x1xf32>
    %cst_6 = arith.constant 3.125000e-02 : f32
    %8 = vector.broadcast %cst_6 : f32 to vector<16x1xf32>
    %9 = arith.mulf %7, %8 : vector<16x1xf32>
    %10 = arith.mulf %5, %5 : vector<16x128xf32>
    %cst_7 = arith.constant dense<0.000000e+00> : vector<16xf32>
    %11 = vector.multi_reduction <add>, %10, %cst_7 [1] : vector<16x128xf32> to vector<16xf32>
    %12 = vector.shape_cast %11 : vector<16xf32> to vector<16x1xf32>
    %cst_8 = arith.constant 3.125000e-02 : f32
    %13 = vector.broadcast %cst_8 : f32 to vector<16x1xf32>
    %14 = arith.mulf %12, %13 : vector<16x1xf32>
    %15 = arith.mulf %9, %9 : vector<16x1xf32>
    %16 = arith.subf %14, %15 : vector<16x1xf32>
    %cst_9 = arith.constant 9.99999974E-6 : f32
    %17 = vector.broadcast %cst_9 : f32 to vector<16x1xf32>
    %18 = arith.addf %16, %17 : vector<16x1xf32>
    %19 = math.rsqrt %18 : vector<16x1xf32>
    %20 = vector.broadcast %9 : vector<16x1xf32> to vector<16x128xf32>
    %21 = arith.subf %5, %20 : vector<16x128xf32>
    %22 = vector.broadcast %19 : vector<16x1xf32> to vector<16x128xf32>
    %23 = arith.mulf %21, %22 : vector<16x128xf32>
    %c1 = arith.constant 1 : index
    %c0_10 = arith.constant 0 : index
    %24 = vector.load %arg3[%c1, %c0_10] : memref<3x128xf32, #tpu.memory_space<vmem>>, vector<1x128xf32>
    %25 = vector.broadcast %24 : vector<1x128xf32> to vector<16x128xf32>
    %26 = arith.mulf %23, %25 : vector<16x128xf32>
    %c2 = arith.constant 2 : index
    %c0_11 = arith.constant 0 : index
    %27 = vector.load %arg3[%c2, %c0_11] : memref<3x128xf32, #tpu.memory_space<vmem>>, vector<1x128xf32>
    %28 = vector.broadcast %27 : vector<1x128xf32> to vector<16x128xf32>
    %29 = arith.addf %26, %28 : vector<16x128xf32>
    %c0_12 = arith.constant 0 : index
    %c0_13 = arith.constant 0 : index
    %30 = vector.load %arg4[%c0_12, %c0_13] : memref<16x128xf32, #tpu.memory_space<vmem>>, vector<16x128xf32>
    tpu.vector_store %arg4[%c0_12, %c0_13], %29 {strides = array<i32>} : memref<16x128xf32, #tpu.memory_space<vmem>>, vector<16x128xf32>,
    return
  }
  func.func @transform_0(%arg0: i32) -> (i32, i32) {
    %c0_i32 = arith.constant 0 : i32
    %c0_i32_0 = arith.constant 0 : i32
    return %arg0, %c0_i32 : i32, i32
  }
  func.func @transform_1(%arg0: i32) -> (i32, i32) {
    %c0_i32 = arith.constant 0 : i32
    %c0_i32_0 = arith.constant 0 : i32
    %c0_i32_1 = arith.constant 0 : i32
    return %c0_i32, %c0_i32_0 : i32, i32
  }
  func.func @transform_2(%arg0: i32) -> (i32, i32) {
    %c0_i32 = arith.constant 0 : i32
    %c0_i32_0 = arith.constant 0 : i32
    %c0_i32_1 = arith.constant 0 : i32
    return %c0_i32, %c0_i32_0 : i32, i32
  }
  func.func @transform_3(%arg0: i32) -> (i32, i32) {
    %c0_i32 = arith.constant 0 : i32
    %c0_i32_0 = arith.constant 0 : i32
    return %arg0, %c0_i32 : i32, i32
  }
}

</mosaic_0001>

<bundles_post_ra>
// kernel: tpu_custom_call.1
= control target key start
LH: loop header
LB: loop body
LE: loop exit
PB: predicated region body
PF: predicated region fallthrough
CT: control target
= control target key end

     0   :  { %8 = vsyncpa [#allocation3], 0  ;;  %s995_s0 = inlined_call_operand.hbm [shape: f32[32,128], index: 0, kind: input, shape index: {}]   ;;  %s996_s1 = inlined_call_operand.hbm [shape: f32[128,128], index: 1, kind: input, shape index: {}]   ;;  %s997_s2 = inlined_call_operand.vmem [shape: f32[3,128], index: 2, kind: input, shape index: {}]   ;;  %s998_s3 = inlined_call_operand.hbm [shape: f32[32,128], index: 3, kind: output, shape index: {}]  }
   0x1   :  { %10 = vsyncpa [#allocation3 + $0x1], 0 }
   0x2   :  { %11 = vsyncpa [#allocation6], 0 }
   0x3   :  { %12 = vsyncpa [#allocation4], 0 }
   0x4   :  { %14 = vsyncpa [#allocation4 + $0x1], 0  ;;  %s771_s12 = smov 0   ;;  %s773_s13 = smov 0  }
   0x5   :  { %s775_s14 = smov 0   ;;  %s777_s15 = smov 0  }
   0x6 LB: > { %s792_s16 = sadd.s32 4294967295, %s742_s15   ;;  %s443_s17 = sadd.s32 4294967294, %s742_s15   ;;  %s742_s15 = sphi %s777_s15, %s1018_s15   ;;  %s738_s14 = sphi %s775_s14, %s1017_s14   ;;  %s734_s13 = sphi %s773_s13, %s1016_s13   ;;  %s730_s12 = sphi %s771_s12, %s1015_s12  }
   0x7   : > { %p40_p0 = scmp.ne.s32.totalorder %s734_s13, %s730_s12  ;;  %p999_p1 = scmp.eq.s32.totalorder %s792_s16, 0 }
   0x8   : > { %p112_p3 = scmp.eq.s32.totalorder %s443_s17, 1  ;;  %p444_p5 = scmp.ge.s32.totalorder %s742_s15, 1 }
   0x9   : > { %p801_p4 = por %p999_p1, %p40_p0  ;;  %p119_p7 = scmp.lt.s32.totalorder %s742_s15, 3 }
   0xa   : > { %p806_p6 = por %p112_p3, %p40_p0  ;;  %s744_s21 = smov [#allocation5]  }
   0xb   : > { %s1002_s18 = scalar_select %p801_p4, 1, 0 }
   0xc   : > { %s1003_s19 = scalar_select %p806_p6, 1, 0 }
   0xd   : > { %p811_p8 = pnand %p444_p5, %p119_p7  ;;  %s131_s22 = sshll.u32 %s744_s21, 4  ;;  %s815_s22 = int_to_ptr.vmem [resolvable:$true] %s131_s22 }
   0xe   : > { %s827_s24 = sadd.s32 1, %s742_s15   ;;  %s27_s25 = sadd.s32 1, %s738_s14 }
   0xf   : > { %s1004_s20 = scalar_select %p811_p8, 1, 0 }
  0x10   : > { %p557_p9 = pneg %p811_p8  ;;  %s24_s26 = ssub.s32 %s742_s15, %s827_s24 }
  0x11   : > { %s614_s29 = scalar_lea.hbm %s996_s1, 2048 }
  0x12   : > { %p822_p11 = pnand %p557_p9, %p999_p1  ;;  %p615_p12 = scmp.ne.s32.totalorder %s996_s1, %s614_s29 }
  0x13   : > { %p621_p5 = scmp.lt.u32.totalorder %s614_s29, %s996_s1 }
  0x14   : > { %p616_p13 = pneg %p822_p11 }
  0x16   : > { %p617_p0 = pnand %p616_p13, %p615_p12 }
  0x18   : > { %p618_p3 = pneg %p617_p0 }
  0x1a   : > { %p623_p7 = pnand %p621_p5, %p618_p3 }
  0x1c   : > { %626 = shalt.err (!%p623_p7)
}
  0x1d   : > { %s627_s7 = scalar_lea.vmem %s815_s22, 2048  ;;  %p635_p2 = scmp.lt.s32.totalorder %s815_s22, %s815_s22 }
  0x1e   : > { %p628_p9 = scmp.ne.s32.totalorder %s815_s22, %s627_s7  ;;  %p636_p6 = scmp.lt.s32.totalorder %s627_s7, %s627_s7 }
  0x20   : > { %p630_p10 = pnand %p628_p9, %p616_p13  ;;  %p637_p4 = por %p636_p6, %p635_p2 }
  0x22   : > { %p631_p1 = pneg %p630_p10 }
  0x24   : > { %p638_p8 = pnand %p637_p4, %p631_p1 }
  0x26   : > { %641 = shalt.err (!%p638_p8)
}
  0x27   : > { %s745_s8 = smov 128   ;;  %s746_s9 = smov 8  }
  0x28   : > { %560 = dma.hbm_to_vmem [thread:$0]  (!%p822_p11), %s996_s1, 2048, %s815_s22, [#allocation6], %s745_s8, %s745_s8, %s746_s9  }
  0x29   : > { %p25_p1 = scmp.eq.s32.totalorder %s24_s26, 0  ;;  %p34_p2 = scmp.ne.s32.totalorder %s738_s14, %s734_s13 }
  0x2a   : > { %p35_p4 = scmp.eq.s32.totalorder %s742_s15, 0  ;;  %p570_p6 = scmp.lt.s32.totalorder %s742_s15, 2 }
  0x2b   : > { %s861_s17 = scalar_select %p25_p1, %s738_s14, %s27_s25  }
  0x2c   : > { %p36_p8 = por %p35_p4, %p34_p2  ;;  %p1006_p10 = scmp.eq.s32.totalorder %s792_s16, 1 }
  0x2d   : > { %s148_s23 = sand.u32 1, %s738_s14   ;;  %s462_s27 = sshll.u32 %s742_s15, 8 }
  0x2e   : > { %p865_p12 = por %p1006_p10, %p34_p2  ;;  %s447_s28 = sshll.u32 %s148_s23, 4 }
  0x2f   : > { %s874_s4 = scalar_lea.hbm %s995_s0, %s462_s27  ;;  %s152_s22 = scalar_lea.vmem [#allocation2], %s447_s28 }
  0x30   : > { %s159_s25 = sshll.u32 %s152_s22, 4  ;;  %p876_p11 = pnand %p570_p6, %p36_p8  ;;  %s880_s25 = int_to_ptr.vmem [resolvable:$true] %s159_s25 }
  0x31   : > { %s882_s5 = scalar_lea.sflag [#allocation3], %s148_s23  ;;  %s642_s6 = scalar_lea.hbm %s874_s4, 256 }
  0x32   : > { %p643_p13 = scmp.ne.s32.totalorder %s874_s4, %s642_s6  ;;  %p644_p0 = pneg %p876_p11 }
  0x33   : > { %s647_s11 = scalar_lea.hbm %s995_s0, 512  ;;  %p648_p7 = scmp.lt.u32.totalorder %s874_s4, %s995_s0 }
  0x34   : > { %p645_p3 = pnand %p644_p0, %p643_p13  ;;  %p649_p9 = scmp.lt.u32.totalorder %s647_s11, %s642_s6 }
  0x35   : > { %p651_p2 = scmp.lt.u32.totalorder %s642_s6, %s874_s4 }
  0x36   : > { %p646_p5 = pneg %p645_p3  ;;  %p650_p1 = por %p649_p9, %p648_p7 }
  0x38   : > { %p652_p4 = por %p651_p2, %p650_p1 }
  0x3a   : > { %p653_p6 = pnand %p652_p4, %p646_p5 }
  0x3c   : > { %656 = shalt.err (!%p653_p6)
}
  0x3d   : > { %s657_s23 = scalar_lea.vmem %s880_s25, 256  ;;  %s747_s29 = smov [#allocation2]  }
  0x3e   : > { %p658_p8 = scmp.ne.s32.totalorder %s880_s25, %s657_s23  ;;  %s662_s30 = sshll.u32 %s747_s29, 4  ;;  %s663_s30 = int_to_ptr.vmem [resolvable:$false] %s662_s30 }
  0x3f   : > { %s664_s22 = scalar_lea.vmem %s663_s30, 512  ;;  %p665_p3 = scmp.lt.s32.totalorder %s880_s25, %s663_s30 }
  0x40   : > { %p660_p10 = pnand %p658_p8, %p644_p0  ;;  %p666_p7 = scmp.lt.s32.totalorder %s664_s22, %s657_s23 }
  0x42   : > { %p661_p13 = pneg %p660_p10  ;;  %p667_p9 = por %p666_p7, %p665_p3 }
  0x44   : > { %p668_p1 = pnand %p667_p9, %p661_p13 }
  0x46   : > { %671 = shalt.err (!%p668_p1)
}
  0x47   : > { %564 = dma.hbm_to_vmem [thread:$0]  (!%p876_p11), %s874_s4, 256, %s880_s25, %s882_s5, %s745_s8, %s745_s8, %s746_s9  }
  0x48   : > { %p1009_p0 = scmp.ne.s32.totalorder %s1004_s20, 0 }
  0x49   : > { %s916_s6 = sand.u32 (!%p1009_p0), 1, %s734_s13   ;;  %p1010_p5 = scmp.ne.s32.totalorder (!%p1009_p0), %s1002_s18, 0 }
  0x4a   : > { %171 = sbr.rel (%p1009_p0) target bundleno = 521 (0x209), region = 32  ;;  %s451_s7 = sshll.u32 (!%p1009_p0), %s916_s6, 4 }
  0x4b   : > { %s174_s10 = scalar_lea.sflag (!%p1009_p0), [#allocation3], %s916_s6  ;;  %s922_s26 = scalar_lea.vmem (!%p1009_p0), [#allocation2], %s451_s7 }
  0x51   : > { %717 = dma.done.wait (%p1010_p5), %s174_s10, 256  }
  0x52   : > { %719 = vsyncadd (%p1010_p5), %s174_s10, 4294967040  ;;  %p1011_p11 = scmp.eq.s32.totalorder %s792_s16, 0 }
  0x54   : > { %721 = dma.done.wait (%p1011_p11), [#allocation6], 2048   ;;  %p1012_p2 = pmov %p1011_p11 }
  0x55   : > { %v208_v0 = vld [vmem:[#allocation5] sm:$0xff]  ;;  %v209_v1 = vld [vmem:[#allocation5 + $0x8] sm:$0xff]  ;;  %v210_v2 = vld [vmem:[#allocation5 + $0x10] sm:$0xff]  ;;  %s463_s5 = sshll.u32 %s792_s16, 8  ;;  %s203_s11 = scalar_lea.vmem [#allocation7], %s451_s7 }
  0x56   : > { %723 = vsyncadd (%p1012_p2), [#allocation6], 4294965248  ;;  %v517_v3 = vpack.c.bf16 %v209_v1, %v208_v0  ;;  %v211_v4 = vld [vmem:[#allocation5 + $0x18] sm:$0xff]  ;;  %v212_v6 = vld [vmem:[#allocation5 + $0x20] sm:$0xff]  ;;  %s360_s27 = sshll.u32 %s203_s11, 4  ;;  %s949_s29 = scalar_lea.hbm %s998_s3, %s463_s5  ;;  %s951_s27 = int_to_ptr.vmem [resolvable:$true] %s360_s27 }
  0x57   : > { %v521_v5 = vpack.c.bf16 %v211_v4, %v210_v2  ;;  %v213_v7 = vld [vmem:[#allocation5 + $0x28] sm:$0xff]  ;;  %v206_v9 = vld [vmem:[%s922_s26] sm:$0xff]  ;;  %v215_v11 = vld [vmem:[#allocation5 + $0x38] sm:$0xff]  ;;  %s347_s30 = scalar_lea.sflag [#allocation4], %s916_s6  ;;  %s672_s22 = scalar_lea.vmem %s951_s27, 256 }
  0x58   : > { %518 = vmatprep.subr.bf16.mxu0 %v517_v3  ;;  %v525_v8 = vpack.c.bf16 %v213_v7, %v212_v6  ;;  %v214_v10 = vld [vmem:[#allocation5 + $0x30] sm:$0xff]  ;;  %514 = vmatprep.mubr.f32.mxu0 %v206_v9  ;;  %v216_v13 = vld [vmem:[#allocation5 + $0x40] sm:$0xff]  ;;  %v217_v14 = vld [vmem:[#allocation5 + $0x48] sm:$0xff]  ;;  %p673_p4 = scmp.ne.s32.totalorder %s951_s27, %s672_s22  ;;  %s748_s16 = smov [#allocation7]  }
  0x59   : > { %520 = vmatpush3.bf16.msra.mxu0 %v517_v3  ;;  %v529_v12 = vpack.c.bf16 %v215_v11, %v214_v10  ;;  %v533_v15 = vpack.c.bf16 %v217_v14, %v216_v13  ;;  %v218_v16 = vld [vmem:[#allocation5 + $0x50] sm:$0xff]  ;;  %v219_v17 = vld [vmem:[#allocation5 + $0x58] sm:$0xff]  ;;  %v220_v19 = vld [vmem:[#allocation5 + $0x60] sm:$0xff]  ;;  %s676_s7 = sshll.u32 %s748_s16, 4  ;;  %s677_s7 = int_to_ptr.vmem [resolvable:$false] %s676_s7 }
  0x5a   : > { %522 = vmatprep.subr.bf16.mxu0 %v521_v5  ;;  %v537_v18 = vpack.c.bf16 %v219_v17, %v218_v16  ;;  %v221_v20 = vld [vmem:[#allocation5 + $0x68] sm:$0xff]  ;;  %v222_v22 = vld [vmem:[#allocation5 + $0x70] sm:$0xff]  ;;  %v223_v23 = vld [vmem:[#allocation5 + $0x78] sm:$0xff]  ;;  %p674_p6 = pnand %p673_p4, %p865_p12  ;;  %s678_s10 = scalar_lea.vmem %s677_s7, 512 }
  0x5b   : > { %v541_v21 = vpack.c.bf16 %v221_v20, %v220_v19  ;;  %v545_v24 = vpack.c.bf16 %v223_v23, %v222_v22  ;;  %v207_v25 = vld [vmem:[%s922_s26 + $0x8] sm:$0xff]  ;;  %v454_v26 = vld [vmem:[%s997_s2] ss:$0 sm:$0xff]  ;;  %v455_v49 = vld [vmem:[%s997_s2 + $0x1] ss:$0 sm:$0xff]  ;;  %p679_p10 = scmp.lt.s32.totalorder %s951_s27, %s677_s7  ;;  %p680_p13 = scmp.lt.s32.totalorder %s678_s10, %s672_s22 }
  0x5c   : > { %v456_v51 = vld [vmem:[%s997_s2 + $0x2] ss:$0 sm:$0xff]  ;;  %p675_p8 = pneg %p674_p6 }
  0x5d   : > { %524 = vmatpush3.bf16.msra.mxu0 %v521_v5  ;;  %p681_p3 = por %p680_p13, %p679_p10 }
  0x5e   : > { %526 = vmatprep.subr.bf16.mxu0 %v525_v8 }
  0x5f   : > { %p682_p7 = pnand %p681_p3, %p675_p8 }
  0x61   : > { %528 = vmatpush3.bf16.msra.mxu0 %v525_v8 }
  0x62   : > { %530 = vmatprep.subr.bf16.mxu0 %v529_v12 }
  0x65   : > { %532 = vmatpush3.bf16.msra.mxu0 %v529_v12 }
  0x66   : > { %534 = vmatprep.subr.bf16.mxu0 %v533_v15 }
  0x69   : > { %536 = vmatpush3.bf16.msra.mxu0 %v533_v15 }
  0x6a   : > { %538 = vmatprep.subr.bf16.mxu0 %v537_v18 }
  0x6d   : > { %540 = vmatpush3.bf16.msra.mxu0 %v537_v18 }
  0x6e   : > { %542 = vmatprep.subr.bf16.mxu0 %v541_v21 }
  0x71   : > { %544 = vmatpush3.bf16.msra.mxu0 %v541_v21 }
  0x72   : > { %546 = vmatprep.subr.bf16.mxu0 %v545_v24 }
  0x75   : > { %548 = vmatpush3.bf16.msra.mxu0 %v545_v24 }
  0x78   : > { %515 = vmatmul.mubr.f32.vlgmr.msra.gmra.mrb[0].mxu0 %v207_v25 }
 0x14b   : > { %v516_v27 = vpop.f32.mrb[0].mxu0 }
 0x14c   : > { %v295_v28 = vpop.f32.mrb[1].mxu0  ;;  %v301_v30 = vadd.f32 %v516_v27, %v454_v26 }
 0x14d   : > { %v296_v29 = vadd.f32 %v454_v26, %v295_v28 }
 0x14e   : > { %v311_v32 = vmul.f32 %v301_v30, %v301_v30 }
 0x14f   : > { %304 = vadd.xlane.f32.xlu0 %v296_v29  ;;  %v310_v31 = vmul.f32 %v296_v29, %v296_v29 }
 0x151   : > { %312 = vadd.xlane.f32.xlu1 %v310_v31 }
 0x153   : > { %306 = vadd.xlane.f32.xlu0 %v301_v30 }
 0x155   : > { %314 = vadd.xlane.f32.xlu1 %v311_v32 }
 0x1dc   : > { %v305_v33 = vpop.xlane.xlu0 %304 }
 0x1dd   : > { %v308_v34 = vmul.f32 0.03125, %v305_v33 }
 0x1de   : > { %v313_v35 = vpop.xlane.xlu1 %312 }
 0x1df   : > { %v318_v36 = vmul.f32 %v308_v34, %v308_v34  ;;  %v316_v37 = vmul.f32 0.03125, %v313_v35  ;;  %v326_v47 = vsub.f32 %v296_v29, %v308_v34 }
 0x1e0   : > { %v307_v38 = vpop.xlane.xlu0 %306 }
 0x1e1   : > { %v320_v39 = vsub.f32 %v316_v37, %v318_v36  ;;  %v309_v40 = vmul.f32 0.03125, %v307_v38 }
 0x1e2   : > { %v315_v41 = vpop.xlane.xlu1 %314 }
 0x1e3   : > { %v322_v42 = vadd.f32 1e-05, %v320_v39  ;;  %v319_v43 = vmul.f32 %v309_v40, %v309_v40  ;;  %v317_v44 = vmul.f32 0.03125, %v315_v41  ;;  %v327_v53 = vsub.f32 %v301_v30, %v309_v40 }
 0x1e5   : > { %610 = vrsqrt.f32 %v322_v42  ;;  %v321_v45 = vsub.f32 %v317_v44, %v319_v43 }
 0x1e7   : > { %v323_v46 = vadd.f32 1e-05, %v321_v45 }
 0x1e9   : > { %612 = vrsqrt.f32 %v323_v46 }
 0x1ef   : > { %v611_v48 = vpop.eup %610 }
 0x1f0   : > { %v328_v50 = vmul.f32 %v611_v48, %v326_v47 }
 0x1f2   : > { %v335_v52 = vmul.f32 %v455_v49, %v328_v50 }
 0x1f3   : > { %v613_v54 = vpop.eup %612 }
 0x1f4   : > { %v342_v55 = vadd.f32 %v456_v51, %v335_v52  ;;  %v329_v56 = vmul.f32 %v613_v54, %v327_v53 }
 0x1f6   : > { %v336_v57 = vmul.f32 %v455_v49, %v329_v56  ;;  %344 = vst [vmem:[%s203_s11] sm:$0xff] %v342_v55 }
 0x1f8   : > { %v343_v58 = vadd.f32 %v456_v51, %v336_v57 }
 0x1fa   : > { %345 = vst [vmem:[%s203_s11 + $0x8] sm:$0xff] %v343_v58 }
 0x1fb   : > { %685 = shalt.err (!%p682_p7)
}
 0x1fc   : > { %s686_s26 = scalar_lea.hbm %s949_s29, 256  ;;  %s690_s8 = scalar_lea.hbm %s998_s3, 512 }
 0x1fd   : > { %p687_p9 = scmp.ne.s32.totalorder %s949_s29, %s686_s26  ;;  %p691_p5 = scmp.lt.u32.totalorder %s949_s29, %s998_s3 }
 0x1fe   : > { %p692_p11 = scmp.lt.u32.totalorder %s690_s8, %s686_s26  ;;  %p694_p4 = scmp.lt.u32.totalorder %s686_s26, %s949_s29 }
 0x1ff   : > { %p688_p1 = pnand %p687_p9, %p865_p12 }
 0x200   : > { %p693_p2 = por %p692_p11, %p691_p5 }
 0x201   : > { %p689_p0 = pneg %p688_p1 }
 0x202   : > { %p695_p6 = por %p694_p4, %p693_p2 }
 0x204   : > { %p696_p8 = pnand %p695_p6, %p689_p0 }
 0x206   : > { %699 = shalt.err (!%p696_p8)
}
 0x207   : > { %s749_s25 = smov 128   ;;  %s750_s5 = smov 8  }
 0x208   : > { %555 = dma.vmem_to_hbm [thread:$0]  (%p865_p12), %s951_s27, 256, %s949_s29, %s347_s30, %s749_s25, %s749_s25, %s750_s5  }
 0x209 PF: > { %s375_s11 = sand.u32 1, %s730_s12   ;;  %p1013_p10 = scmp.ne.s32.totalorder %s1003_s19, 0 }
 0x20a   : > { %p1014_p13 = scmp.ge.s32.totalorder %s742_s15, 2  ;;  %s376_s28 = scalar_lea.sflag [#allocation4], %s375_s11 }
 0x20c   : > { %p566_p3 = pnand %p1014_p13, %p1013_p10 }
 0x20e   : > { %725 = dma.done.wait (!%p566_p3), %s376_s28, 256  }
 0x20f   : > { %727 = vsyncadd (!%p566_p3), %s376_s28, 4294967040  ;;  %p17_p7 = scmp.ge.s32.totalorder %s827_s24, 4   ;;  %s1015_s12 = smov %s734_s13 }
 0x210   : > { %s1016_s13 = smov %s738_s14  ;;  %s1017_s14 = smov %s861_s17 }
 0x211   : > { %s1018_s15 = smov %s827_s24  ;;  %19 = sbr.rel (!%p17_p7) target bundleno = 6 (0x6), region = 81 }
 0x218   :  { %381 = vsyncpa [#allocation3], 1 }
 0x219   :  { %383 = vsyncpa [#allocation3 + $0x1], 1 }
 0x21a   :  { %384 = vsyncpa [#allocation6], 1 }
 0x21b   :  { %385 = vsyncpa [#allocation4], 1 }
 0x21c   :  { %387 = vsyncpa [#allocation4 + $0x1], 1 }

</bundles_post_ra>
